<compile_context>
chip_gen: v7x
topology: tpu7x:2x2x1
jax: 0.10.0
libtpu: 0.0.40
codegen_flags: <defaults>
</compile_context>

<pallas_src>
import jax
import jax.numpy as jnp
from jax.experimental import pallas as pl
from jax.experimental.pallas import tpu as pltpu

EPS = 1e-5  # nn.BatchNorm2d default eps


# ---------------------------------------------------------------------------
# Host-side helper: 3x3 conv (one output row at a time) as a banded matmul.
#   LHS row r  = [ padded_row(r-1) | padded_row(r) | padded_row(r+1) ]   (lanes)
#   padded_row = [0_C | col 0 | col 1 | ... | col Pw-1 | 0_C],  lane = w_pos*C + c
#   RHS[ky*(Pw+2)*C + w_pos*C + c, j*Cout + co] = w[ky, w_pos - j, c, co]
# ---------------------------------------------------------------------------
def _build_row_matmul_weight(w_hwio_scaled, Pw):
    kh, kw, cin, cout = w_hwio_scaled.shape          # (3, 3, Cin, Cout)
    Pw2 = Pw + 2
    wstack = jnp.zeros((kh, Pw2, cin, Pw, cout), jnp.float32)
    for kx in range(kw):
        for j in range(Pw):
            wstack = wstack.at[:, j + kx, :, j, :].set(w_hwio_scaled[:, kx, :, :])
    return wstack.reshape(kh * Pw2 * cin, Pw * cout)


# ------------------------- fused DownBlock forward --------------------------
def down_block_forward(x_nhwc, params):
    """x_nhwc: (B, H, W, Cin) f32; params: list of ConvBatchNorm parameters."""
    B, H, W, Cin = x_nhwc.shape
    Ph, Pw = H // 2, W // 2
    nb = len(params)

    # Layout plumbing (wrapper side, not compute): present the input as its
    # four 2x2-pooling phases, each already in the kernel's (rows, W*C) layout.
    phases = jnp.stack(
        [x_nhwc[:, 0::2, 0::2, :], x_nhwc[:, 0::2, 1::2, :],
         x_nhwc[:, 1::2, 0::2, :], x_nhwc[:, 1::2, 1::2, :]], axis=0)
    phases = phases.reshape(4, B * Ph, Pw * Cin)

    # One invocation folds B into M; split across 2 blocks (both v7x TCs) only
    # when the batch is large enough to pay for it.
    grid_g = 2 if (B >= 4 and B % 2 == 0 and Ph % 8 == 0) else 1
    Bb = B // grid_g
    M_rows = Bb * Ph

    # Row masks that zero the vertical halo (rows whose "above"/"below"
    # neighbour belongs to another image or is outside the image).
    ridx = jnp.arange(M_rows) % Ph
    mask_top = (ridx != 0).astype(jnp.float32).reshape(M_rows, 1)
    mask_bot = (ridx != Ph - 1).astype(jnp.float32).reshape(M_rows, 1)

    # Per-layer parameters: BN scale folded into bf16 weights, bias kept f32.
    cin_list, cout_list = [], []
    args = [phases, mask_top, mask_bot]
    in_specs = [pl.BlockSpec((4, M_rows, Pw * Cin), lambda g: (0, g, 0)),
                pl.BlockSpec((M_rows, 1), lambda g: (0, 0)),
                pl.BlockSpec((M_rows, 1), lambda g: (0, 0))]
    cin = Cin
    for p in params:
        cout = p["w_hwio"].shape[-1]
        scale = p["gamma"] / jnp.sqrt(p["running_var"] + EPS)
        bias_c = p["beta"] + (p["conv_b"] - p["running_mean"]) * scale
        wmat = _build_row_matmul_weight(p["w_hwio"] * scale, Pw).astype(jnp.bfloat16)
        brow = jnp.tile(bias_c, Pw).reshape(1, Pw * cout).astype(jnp.float32)
        args += [wmat, brow]
        in_specs += [pl.BlockSpec(wmat.shape, lambda g: (0, 0)),
                     pl.BlockSpec(brow.shape, lambda g: (0, 0))]
        cin_list.append(cin)
        cout_list.append(cout)
        cin = cout
    cout_last = cout_list[-1]
    Cmax = max(cin_list)
    scr_shape = (M_rows + 2, (Pw + 2) * Cmax)   # persistent f32 halo scratch

    def kernel(x_ref, tmask_ref, bmask_ref, *rest):
        # rest = (w_0, b_0, ..., w_{nb-1}, b_{nb-1}, o_ref, scr_ref)
        o_ref = rest[2 * nb]
        scr_ref = rest[2 * nb + 1]

        # MaxPool2d(2): elementwise max of the four phases (f32 math).
        h = jnp.maximum(jnp.maximum(x_ref[0], x_ref[1]),
                        jnp.maximum(x_ref[2], x_ref[3]))      # (M_rows, Pw*Cin)
        top_ok = tmask_ref[...]                               # (M_rows, 1) 0/1
        bot_ok = bmask_ref[...]

        for i in range(nb):
            w_ref, b_ref = rest[2 * i], rest[2 * i + 1]
            C = cin_list[i]
            Lc = (Pw + 2) * C
            # Halo scratch: zero borders / stale lanes once, store interior.
            # (f32 scratch keeps all sublane offsets at native 32-bit alignment.)
            scr_ref[...] = jnp.zeros(scr_shape, jnp.float32)
            scr_ref[1:1 + M_rows, C:C + Pw * C] = h
            # Three row-shifted views (ky = 0, 1, 2); vertical halo via masks.
            up = scr_ref[0:M_rows, 0:Lc] * top_ok
            mid = scr_ref[1:1 + M_rows, 0:Lc]
            dn = scr_ref[2:2 + M_rows, 0:Lc] * bot_ok
            lhs = jnp.concatenate([up, mid, dn], axis=-1).astype(jnp.bfloat16)
            # Conv3x3 + folded BN as one MXU matmul; epilogue in f32.
            acc = jnp.dot(lhs, w_ref[...], preferred_element_type=jnp.float32)
            h = jnp.maximum(acc + b_ref[...], 0.0)            # (M_rows, Pw*Cout)

        o_ref[...] = h.astype(o_ref.dtype)

    # Advisory cost estimate for the XLA scheduler.
    flops = 3 * B * Ph * Pw * Cin                     # pooling maxes (tiny)
    bytes_accessed = phases.size * 4 + B * Ph * Pw * cout_last * 4
    for ci, co in zip(cin_list, cout_list):
        flops += 2 * (B * Ph) * (3 * (Pw + 2) * ci) * (Pw * co)
        bytes_accessed += (3 * (Pw + 2) * ci) * (Pw * co) * 2 + Pw * co * 4

    out2d = pl.pallas_call(
        kernel,
        out_shape=jax.ShapeDtypeStruct((B * Ph, Pw * cout_last), x_nhwc.dtype),
        grid=(grid_g,),
        in_specs=in_specs,
        out_specs=pl.BlockSpec((M_rows, Pw * cout_last), lambda g: (g, 0)),
        scratch_shapes=[pltpu.VMEM(scr_shape, jnp.float32)],
        compiler_params=pltpu.CompilerParams(
            dimension_semantics=("parallel",)),
        cost_estimate=pl.CostEstimate(
            flops=int(flops), transcendentals=0,
            bytes_accessed=int(bytes_accessed)),
    )(*args)

    # (B*Ph, Pw*Cout) is row-major identical to (B, Ph, Pw, Cout): free reshape.
    return out2d.reshape(B, Ph, Pw, cout_last)


# ------------------------- synthetic parameters -----------------------------
def init_params(key, in_ch, out_ch, nb_conv):
    """Deterministic synthetic parameters matching ConvBatchNorm shapes."""
    params = []
    cin = in_ch
    for _ in range(nb_conv):
        key, k1, k2, k3, k4, k5, k6 = jax.random.split(key, 7)
        fan_in = cin * 9
        bound = 1.0 / (fan_in ** 0.5)
        w_oihw = jax.random.uniform(k1, (out_ch, cin, 3, 3), jnp.float32,
                                    -bound, bound)
        conv_b = jax.random.uniform(k2, (out_ch,), jnp.float32, -bound, bound)
        gamma = 1.0 + 0.1 * jax.random.normal(k3, (out_ch,), jnp.float32)
        beta = 0.1 * jax.random.normal(k4, (out_ch,), jnp.float32)
        rm = 0.1 * jax.random.normal(k5, (out_ch,), jnp.float32)
        rv = 1.0 + 0.1 * jnp.abs(jax.random.normal(k6, (out_ch,), jnp.float32))
        params.append(dict(
            w_hwio=jnp.transpose(w_oihw, (2, 3, 1, 0)),  # OIHW -> HWIO
            conv_b=conv_b, gamma=gamma, beta=beta,
            running_mean=rm, running_var=rv))
        cin = out_ch
    return params


# ----------------------------- JAX reference --------------------------------
def ref_down_block(x_nhwc, params):
    B, H, W, C = x_nhwc.shape
    y = x_nhwc.reshape(B, H // 2, 2, W // 2, 2, C).max(axis=(2, 4))
    for p in params:
        y = jax.lax.conv_general_dilated(
            y, p["w_hwio"], window_strides=(1, 1), padding="SAME",
            dimension_numbers=("NHWC", "HWIO", "NHWC")) + p["conv_b"]
        y = (y - p["running_mean"]) / jnp.sqrt(p["running_var"] + EPS) \
            * p["gamma"] + p["beta"]
        y = jnp.maximum(y, 0.0)
    return y


if __name__ == "__main__":
    B, Cin, H, W = 2, 4, 16, 16      # PyTorch NCHW input shape (2, 4, 16, 16)
    Cout, nb_conv = 8, 2

    key = jax.random.PRNGKey(0)
    kx, kp = jax.random.split(key)
    x_nchw = jax.random.normal(kx, (B, Cin, H, W), jnp.float32)   # torch layout
    x_nhwc = jnp.transpose(x_nchw, (0, 2, 3, 1))                  # kernel layout
    params = init_params(kp, Cin, Cout, nb_conv)

    out = down_block_forward(x_nhwc, params)
    out = jax.block_until_ready(out)

    ref = ref_down_block(x_nhwc, params)   # f32 reference
    assert out.shape == (B, H // 2, W // 2, Cout), out.shape
    # bf16 MXU operands (BN scale folded into weights) with f32 accumulation.
    max_err = float(jnp.max(jnp.abs(out - ref)))
    assert jnp.allclose(out, ref, rtol=5e-2, atol=1e-1), max_err
    print("KERNEL_OK")
</pallas_src>

<mosaic_0001>
module attributes {stable_mosaic.version = 11 : i64} {
  func.func @kernel(%arg0: i32, %arg1: memref<4x16x32xf32, #tpu.memory_space<vmem>>, %arg2: memref<16x1xf32, #tpu.memory_space<vmem>>, %arg3: memref<16x1xf32, #tpu.memory_space<vmem>>, %arg4: memref<120x64xbf16, #tpu.memory_space<vmem>>, %arg5: memref<1x64xf32, #tpu.memory_space<vmem>>, %arg6: memref<240x64xbf16, #tpu.memory_space<vmem>>, %arg7: memref<1x64xf32, #tpu.memory_space<vmem>>, %arg8: memref<16x64xf32, #tpu.memory_space<vmem>>, %arg9: memref<18x80xf32, #tpu.memory_space<vmem>>) attributes {dimension_semantics = [#tpu.dimension_semantics<parallel>], iteration_bounds = array<i64: 1>, scalar_prefetch = 0 : i64, scratch_operands = 1 : i64, tpu.core_type = #tpu.core_type<tc>, window_params = [{transform_indices = @transform_0, window_bounds = array<i64: 4, 16, 32>}, {pipeline_mode = #tpu.pipeline_mode<synchronous>, transform_indices = @transform_1, window_bounds = array<i64: 16, 1>}, {pipeline_mode = #tpu.pipeline_mode<synchronous>, transform_indices = @transform_2, window_bounds = array<i64: 16, 1>}, {pipeline_mode = #tpu.pipeline_mode<synchronous>, transform_indices = @transform_3, window_bounds = array<i64: 120, 64>}, {pipeline_mode = #tpu.pipeline_mode<synchronous>, transform_indices = @transform_4, window_bounds = array<i64: 1, 64>}, {pipeline_mode = #tpu.pipeline_mode<synchronous>, transform_indices = @transform_5, window_bounds = array<i64: 240, 64>}, {pipeline_mode = #tpu.pipeline_mode<synchronous>, transform_indices = @transform_6, window_bounds = array<i64: 1, 64>}, {transform_indices = @transform_7, window_bounds = array<i64: 16, 64>}]} {
    %c0 = arith.constant 0 : index
    %c0_0 = arith.constant 0 : index
    %c0_1 = arith.constant 0 : index
    %0 = vector.load %arg1[%c0, %c0_0, %c0_1] : memref<4x16x32xf32, #tpu.memory_space<vmem>>, vector<1x16x32xf32>
    %1 = vector.shape_cast %0 : vector<1x16x32xf32> to vector<16x32xf32>
    %c1 = arith.constant 1 : index
    %c0_2 = arith.constant 0 : index
    %c0_3 = arith.constant 0 : index
    %2 = vector.load %arg1[%c1, %c0_2, %c0_3] : memref<4x16x32xf32, #tpu.memory_space<vmem>>, vector<1x16x32xf32>
    %3 = vector.shape_cast %2 : vector<1x16x32xf32> to vector<16x32xf32>
    %4 = arith.maximumf %1, %3 : vector<16x32xf32>
    %c2 = arith.constant 2 : index
    %c0_4 = arith.constant 0 : index
    %c0_5 = arith.constant 0 : index
    %5 = vector.load %arg1[%c2, %c0_4, %c0_5] : memref<4x16x32xf32, #tpu.memory_space<vmem>>, vector<1x16x32xf32>
    %6 = vector.shape_cast %5 : vector<1x16x32xf32> to vector<16x32xf32>
    %c3 = arith.constant 3 : index
    %c0_6 = arith.constant 0 : index
    %c0_7 = arith.constant 0 : index
    %7 = vector.load %arg1[%c3, %c0_6, %c0_7] : memref<4x16x32xf32, #tpu.memory_space<vmem>>, vector<1x16x32xf32>
    %8 = vector.shape_cast %7 : vector<1x16x32xf32> to vector<16x32xf32>
    %9 = arith.maximumf %6, %8 : vector<16x32xf32>
    %10 = arith.maximumf %4, %9 : vector<16x32xf32>
    %c0_8 = arith.constant 0 : index
    %c0_9 = arith.constant 0 : index
    %11 = vector.load %arg2[%c0_8, %c0_9] : memref<16x1xf32, #tpu.memory_space<vmem>>, vector<16x1xf32>
    %c0_10 = arith.constant 0 : index
    %c0_11 = arith.constant 0 : index
    %12 = vector.load %arg3[%c0_10, %c0_11] : memref<16x1xf32, #tpu.memory_space<vmem>>, vector<16x1xf32>
    %cst = arith.constant 0.000000e+00 : f32
    %13 = vector.broadcast %cst : f32 to vector<18x80xf32>
    %c0_12 = arith.constant 0 : index
    %c0_13 = arith.constant 0 : index
    %14 = vector.load %arg9[%c0_12, %c0_13] : memref<18x80xf32, #tpu.memory_space<vmem>>, vector<18x80xf32>
    tpu.vector_store %arg9[%c0_12, %c0_13], %13 {strides = array<i32>} : memref<18x80xf32, #tpu.memory_space<vmem>>, vector<18x80xf32>,
    %c1_14 = arith.constant 1 : index
    %c4 = arith.constant 4 : index
    %15 = vector.load %arg9[%c1_14, %c4] : memref<18x80xf32, #tpu.memory_space<vmem>>, vector<16x32xf32>
    tpu.vector_store %arg9[%c1_14, %c4], %10 {strides = array<i32>} : memref<18x80xf32, #tpu.memory_space<vmem>>, vector<16x32xf32>,
    %c0_15 = arith.constant 0 : index
    %c0_16 = arith.constant 0 : index
    %16 = vector.load %arg9[%c0_15, %c0_16] : memref<18x80xf32, #tpu.memory_space<vmem>>, vector<16x40xf32>
    %17 = vector.broadcast %11 : vector<16x1xf32> to vector<16x40xf32>
    %18 = arith.mulf %16, %17 : vector<16x40xf32>
    %c1_17 = arith.constant 1 : index
    %c0_18 = arith.constant 0 : index
    %19 = vector.load %arg9[%c1_17, %c0_18] : memref<18x80xf32, #tpu.memory_space<vmem>>, vector<16x40xf32>
    %c2_19 = arith.constant 2 : index
    %c0_20 = arith.constant 0 : index
    %20 = vector.load %arg9[%c2_19, %c0_20] : memref<18x80xf32, #tpu.memory_space<vmem>>, vector<16x40xf32>
    %21 = vector.broadcast %12 : vector<16x1xf32> to vector<16x40xf32>
    %22 = arith.mulf %20, %21 : vector<16x40xf32>
    %23 = tpu.concatenate %18, %19, %22 in 1 : vector<16x40xf32>, vector<16x40xf32>, vector<16x40xf32> -> vector<16x120xf32>
    %24 = arith.truncf %23 : vector<16x120xf32> to vector<16x120xbf16>
    %c0_21 = arith.constant 0 : index
    %c0_22 = arith.constant 0 : index
    %25 = vector.load %arg4[%c0_21, %c0_22] : memref<120x64xbf16, #tpu.memory_space<vmem>>, vector<120x64xbf16>
    %cst_23 = arith.constant dense<0.000000e+00> : vector<16x64xf32>
    %26 = tpu.matmul %24, %25, %cst_23 {dimension_numbers = #tpu.dot_dimension_numbers<[1], [0], [0], [1], [0, 0, 1, 1], [], []>} : vector<16x120xbf16>, vector<120x64xbf16>, vector<16x64xf32> -> vector<16x64xf32>
    %c0_24 = arith.constant 0 : index
    %c0_25 = arith.constant 0 : index
    %27 = vector.load %arg5[%c0_24, %c0_25] : memref<1x64xf32, #tpu.memory_space<vmem>>, vector<1x64xf32>
    %28 = vector.broadcast %27 : vector<1x64xf32> to vector<16x64xf32>
    %29 = arith.addf %26, %28 : vector<16x64xf32>
    %cst_26 = arith.constant 0.000000e+00 : f32
    %30 = vector.broadcast %cst_26 : f32 to vector<16x64xf32>
    %31 = arith.maximumf %29, %30 : vector<16x64xf32>
    %cst_27 = arith.constant 0.000000e+00 : f32
    %32 = vector.broadcast %cst_27 : f32 to vector<18x80xf32>
    %c0_28 = arith.constant 0 : index
    %c0_29 = arith.constant 0 : index
    %33 = vector.load %arg9[%c0_28, %c0_29] : memref<18x80xf32, #tpu.memory_space<vmem>>, vector<18x80xf32>
    tpu.vector_store %arg9[%c0_28, %c0_29], %32 {strides = array<i32>} : memref<18x80xf32, #tpu.memory_space<vmem>>, vector<18x80xf32>,
    %c1_30 = arith.constant 1 : index
    %c8 = arith.constant 8 : index
    %34 = vector.load %arg9[%c1_30, %c8] : memref<18x80xf32, #tpu.memory_space<vmem>>, vector<16x64xf32>
    tpu.vector_store %arg9[%c1_30, %c8], %31 {strides = array<i32>} : memref<18x80xf32, #tpu.memory_space<vmem>>, vector<16x64xf32>,
    %c0_31 = arith.constant 0 : index
    %c0_32 = arith.constant 0 : index
    %35 = vector.load %arg9[%c0_31, %c0_32] : memref<18x80xf32, #tpu.memory_space<vmem>>, vector<16x80xf32>
    %36 = vector.broadcast %11 : vector<16x1xf32> to vector<16x80xf32>
    %37 = arith.mulf %35, %36 : vector<16x80xf32>
    %c1_33 = arith.constant 1 : index
    %c0_34 = arith.constant 0 : index
    %38 = vector.load %arg9[%c1_33, %c0_34] : memref<18x80xf32, #tpu.memory_space<vmem>>, vector<16x80xf32>
    %c2_35 = arith.constant 2 : index
    %c0_36 = arith.constant 0 : index
    %39 = vector.load %arg9[%c2_35, %c0_36] : memref<18x80xf32, #tpu.memory_space<vmem>>, vector<16x80xf32>
    %40 = vector.broadcast %12 : vector<16x1xf32> to vector<16x80xf32>
    %41 = arith.mulf %39, %40 : vector<16x80xf32>
    %42 = tpu.concatenate %37, %38, %41 in 1 : vector<16x80xf32>, vector<16x80xf32>, vector<16x80xf32> -> vector<16x240xf32>
    %43 = arith.truncf %42 : vector<16x240xf32> to vector<16x240xbf16>
    %c0_37 = arith.constant 0 : index
    %c0_38 = arith.constant 0 : index
    %44 = vector.load %arg6[%c0_37, %c0_38] : memref<240x64xbf16, #tpu.memory_space<vmem>>, vector<240x64xbf16>
    %cst_39 = arith.constant dense<0.000000e+00> : vector<16x64xf32>
    %45 = tpu.matmul %43, %44, %cst_39 {dimension_numbers = #tpu.dot_dimension_numbers<[1], [0], [0], [1], [0, 0, 1, 1], [], []>} : vector<16x240xbf16>, vector<240x64xbf16>, vector<16x64xf32> -> vector<16x64xf32>
    %c0_40 = arith.constant 0 : index
    %c0_41 = arith.constant 0 : index
    %46 = vector.load %arg7[%c0_40, %c0_41] : memref<1x64xf32, #tpu.memory_space<vmem>>, vector<1x64xf32>
    %47 = vector.broadcast %46 : vector<1x64xf32> to vector<16x64xf32>
    %48 = arith.addf %45, %47 : vector<16x64xf32>
    %cst_42 = arith.constant 0.000000e+00 : f32
    %49 = vector.broadcast %cst_42 : f32 to vector<16x64xf32>
    %50 = arith.maximumf %48, %49 : vector<16x64xf32>
    %c0_43 = arith.constant 0 : index
    %c0_44 = arith.constant 0 : index
    %51 = vector.load %arg8[%c0_43, %c0_44] : memref<16x64xf32, #tpu.memory_space<vmem>>, vector<16x64xf32>
    tpu.vector_store %arg8[%c0_43, %c0_44], %50 {strides = array<i32>} : memref<16x64xf32, #tpu.memory_space<vmem>>, vector<16x64xf32>,
    return
  }
  func.func @transform_0(%arg0: i32) -> (i32, i32, i32) {
    %c0_i32 = arith.constant 0 : i32
    %c0_i32_0 = arith.constant 0 : i32
    %c0_i32_1 = arith.constant 0 : i32
    return %c0_i32, %arg0, %c0_i32_0 : i32, i32, i32
  }
  func.func @transform_1(%arg0: i32) -> (i32, i32) {
    %c0_i32 = arith.constant 0 : i32
    %c0_i32_0 = arith.constant 0 : i32
    %c0_i32_1 = arith.constant 0 : i32
    return %c0_i32, %c0_i32_0 : i32, i32
  }
  func.func @transform_2(%arg0: i32) -> (i32, i32) {
    %c0_i32 = arith.constant 0 : i32
    %c0_i32_0 = arith.constant 0 : i32
    %c0_i32_1 = arith.constant 0 : i32
    return %c0_i32, %c0_i32_0 : i32, i32
  }
  func.func @transform_3(%arg0: i32) -> (i32, i32) {
    %c0_i32 = arith.constant 0 : i32
    %c0_i32_0 = arith.constant 0 : i32
    %c0_i32_1 = arith.constant 0 : i32
    return %c0_i32, %c0_i32_0 : i32, i32
  }
  func.func @transform_4(%arg0: i32) -> (i32, i32) {
    %c0_i32 = arith.constant 0 : i32
    %c0_i32_0 = arith.constant 0 : i32
    %c0_i32_1 = arith.constant 0 : i32
    return %c0_i32, %c0_i32_0 : i32, i32
  }
  func.func @transform_5(%arg0: i32) -> (i32, i32) {
    %c0_i32 = arith.constant 0 : i32
    %c0_i32_0 = arith.constant 0 : i32
    %c0_i32_1 = arith.constant 0 : i32
    return %c0_i32, %c0_i32_0 : i32, i32
  }
  func.func @transform_6(%arg0: i32) -> (i32, i32) {
    %c0_i32 = arith.constant 0 : i32
    %c0_i32_0 = arith.constant 0 : i32
    %c0_i32_1 = arith.constant 0 : i32
    return %c0_i32, %c0_i32_0 : i32, i32
  }
  func.func @transform_7(%arg0: i32) -> (i32, i32) {
    %c0_i32 = arith.constant 0 : i32
    %c0_i32_0 = arith.constant 0 : i32
    return %arg0, %c0_i32 : i32, i32
  }
}

</mosaic_0001>

<bundles_post_ra>
// kernel: tpu_custom_call.1
= control target key start
LH: loop header
LB: loop body
LE: loop exit
PB: predicated region body
PF: predicated region fallthrough
CT: control target
= control target key end

     0   :  { %vm49_vm0 = vcmask 654336   ;;  %v616_v3 = vmov 0   ;;  %vm52_vm1 = vcmask 648192   ;;  %v617_v11 = vmov 0.0   ;;  %s618_s21 = smov 4   ;;  %s852_s0 = inlined_call_operand.vmem [shape: f32[4,16,32], index: 0, kind: input, shape index: {}]   ;;  %s853_s1 = inlined_call_operand.vmem [shape: f32[16,1], index: 1, kind: input, shape index: {}]   ;;  %s854_s2 = inlined_call_operand.vmem [shape: f32[16,1], index: 2, kind: input, shape index: {}]   ;;  %s855_s3 = inlined_call_operand.vmem [shape: bf16[120,64], index: 3, kind: input, shape index: {}]   ;;  %s856_s4 = inlined_call_operand.vmem [shape: f32[1,64], index: 4, kind: input, shape index: {}]   ;;  %s857_s5 = inlined_call_operand.vmem [shape: bf16[240,64], index: 5, kind: input, shape index: {}]   ;;  %s858_s6 = inlined_call_operand.vmem [shape: f32[1,64], index: 6, kind: input, shape index: {}]   ;;  %s859_s7 = inlined_call_operand.hbm [shape: f32[16,64], index: 7, kind: output, shape index: {}]  }
   0x1   :  { %v47_v0 = vld [vmem:[%s854_s2] sm:$0xff]  ;;  %v475_v2 = vld [vmem:[%s852_s0 + $0x10] sm:$0xff]  ;;  %547 = vset.pattern.permute.xlu1 %v616_v3  ;;  %548 = vset.pattern.permute.xlu0 %v616_v3  ;;  %v29_v8 = vld [vmem:[%s852_s0 + $0x8] sm:$0xff]  ;;  %50 = vst.msk [vmem:[#allocation2] sm:$0xff] %vm49_vm0, %v617_v11 }
   0x2   :  { %v28_v1 = vld [vmem:[%s852_s0] sm:$0xff]  ;;  %v479_v6 = vld [vmem:[%s852_s0 + $0x30] sm:$0xff]  ;;  %85 = vperm.xlu1 %547, %v47_v0   ;;  %v476_v9 = vld [vmem:[%s852_s0 + $0x18] sm:$0xff]  ;;  %51 = vst.msk [vmem:[#allocation2 + $0x8] sm:$0xff] %vm49_vm0, %v617_v11  ;;  %517 = vmatprep.subr.bf16.mxu0 %v617_v11 }
   0x3   :  { %v33_v4 = vmax.f32 %v28_v1, %v475_v2  ;;  %v477_v5 = vld [vmem:[%s852_s0 + $0x20] sm:$0xff]  ;;  %v478_v10 = vld [vmem:[%s852_s0 + $0x28] sm:$0xff]  ;;  %53 = vst.msk [vmem:[#allocation2 + $0x10] sm:$0x3] %vm52_vm1, %v617_v11  ;;  %v34_v13 = vmax.f32 %v29_v8, %v476_v9  ;;  %v480_v14 = vld [vmem:[%s852_s0 + $0x38] sm:$0xff]  ;;  %413 = vmatprep.subr.bf16.mxu1 %v616_v3 }
   0x4   :  { %v41_v7 = vmax.f32 %v477_v5, %v479_v6  ;;  %v48_v12 = vld [vmem:[%s854_s2 + $0x8] sm:$0xff]  ;;  %v42_v16 = vmax.f32 %v478_v10, %v480_v14  ;;  %v45_v19 = vld [vmem:[%s853_s1] sm:$0xff]  ;;  %v571_v22 = vld [vmem:[%s855_s3 + $0x10] sm:$0xff]  }
   0x5   :  { %v46_v18 = vld [vmem:[%s853_s1 + $0x8] sm:$0xff]  ;;  %v569_v20 = vld [vmem:[%s855_s3] sm:$0xff]  }
   0x6   :  { %v43_v15 = vmax.f32 %v33_v4, %v41_v7  ;;  %90 = vperm.xlu1 %547, %v48_v12   ;;  %v44_v17 = vmax.f32 %v34_v13, %v42_v16  ;;  %v570_v21 = vld [vmem:[%s855_s3 + $0x8] sm:$0xff]   ;;  %518 = vmatpush3.bf16.msra.mxu0 %v569_v20 }
   0x7   :  { %519 = vmatprep.subr.bf16.mxu0 %v617_v11 }
   0x8   :  { %56 = vrot.lane.b32.xlu0 %v43_v15, %s618_s21 }
   0xa   :  { %74 = vperm.xlu1 %547, %v46_v18   ;;  %520 = vmatpush3.bf16.msra.mxu0 %v570_v21 }
   0xb   :  { %521 = vmatprep.subr.bf16.mxu0 %v617_v11 }
   0xc   :  { %58 = vrot.lane.b32.xlu0 %v44_v17, %s618_s21 }
  0x10   :  { %69 = vperm.xlu0 %548, %v45_v19  }
  0x11   :  { %12 = vsyncpa [#allocation4], 0  ;;  %522 = vmatpush3.bf16.msra.mxu0 %v571_v22  ;;  %v572_v23 = vld [vmem:[%s855_s3 + $0x18] sm:$0xff]   ;;  %v573_v24 = vld [vmem:[%s855_s3 + $0x20] sm:$0xff]   ;;  %vm62_vm2 = vcmask 293920   ;;  %vm188_vm3 = vcmask 1043456  }
  0x12   :  { %523 = vmatprep.subr.bf16.mxu0 %v617_v11  ;;  %v574_v25 = vld [vmem:[%s855_s3 + $0x28] sm:$0xff]   ;;  %v575_v27 = vld [vmem:[%s855_s3 + $0x30] sm:$0xff]   ;;  %v576_v29 = vld [vmem:[%s855_s3 + $0x38] ss:$0 sps:$4 sm:$0xff]   ;;  %vm619_vm4 = vmmov 0   ;;  %s620_s3 = smov 40  }
  0x13   :  { %v190_v30 = vsel %vm188_vm3, %v576_v29, 0  ;;  %533 = vmatprep.mubr.msk.bf16.mxu0 %vm619_vm4, %v617_v11  ;;  %s621_s16 = smov 80   ;;  %vm111_vm5 = vcmask 326656   ;;  %vm184_vm6 = vcmask 982016   ;;  %v481_v58 = vld [vmem:[%s856_s4] ss:$0 sm:$0xff] }
  0x14   :  { %s622_s19 = smov 8   ;;  %v577_v4 = vld [vmem:[%s857_s5] sm:$0xff]   ;;  %v578_v5 = vld [vmem:[%s857_s5 + $0x8] sm:$0xff]   ;;  %v579_v6 = vld [vmem:[%s857_s5 + $0x10] sm:$0xff]   ;;  %vm246_vm7 = vcmask 588864   ;;  %s623_s23 = smov 32  }
  0x15   :  { %524 = vmatpush3.bf16.msra.mxu0 %v572_v23  ;;  %414 = vmatpush1.bf16.msra.mxu1 %v577_v4  ;;  %v580_v7 = vld [vmem:[%s857_s5 + $0x18] sm:$0xff]   ;;  %v581_v8 = vld [vmem:[%s857_s5 + $0x20] sm:$0xff]   ;;  %v582_v9 = vld [vmem:[%s857_s5 + $0x28] sm:$0xff]   ;;  %vm277_vm8 = vcmask 261120   ;;  %vm409_vm9 = vcmask 916480   ;;  %vm456_vm10 = vcmask 523264  }
  0x16   :  { %525 = vmatprep.subr.bf16.mxu0 %v617_v11  ;;  %415 = vmatprep.subr.bf16.mxu1 %v616_v3  ;;  %v583_v10 = vld [vmem:[%s857_s5 + $0x30] sm:$0xff]   ;;  %v585_v12 = vld [vmem:[%s857_s5 + $0x40] sm:$0xff]   ;;  %v586_v13 = vld [vmem:[%s857_s5 + $0x48] sm:$0xff]   ;;  %s624_s2 = smov [#allocation3]  }
  0x17   :  { %v587_v14 = vld [vmem:[%s857_s5 + $0x50] sm:$0xff]   ;;  %v588_v15 = vld [vmem:[%s857_s5 + $0x58] sm:$0xff]   ;;  %v589_v16 = vld [vmem:[%s857_s5 + $0x60] sm:$0xff]   ;;  %s464_s24 = sshll.u32 %s624_s2, 4  ;;  %s465_s24 = int_to_ptr.vmem [resolvable:$true] %s464_s24 }
  0x18   :  { %v590_v18 = vld [vmem:[%s857_s5 + $0x68] sm:$0xff]   ;;  %v591_v20 = vld [vmem:[%s857_s5 + $0x70] sm:$0xff]   ;;  %s592_s0 = scalar_lea.vmem %s465_s24, 256  ;;  %p597_p1 = scmp.lt.s32.totalorder %s465_s24, %s465_s24 }
  0x19   :  { %526 = vmatpush3.bf16.msra.mxu0 %v573_v24  ;;  %416 = vmatpush1.bf16.msra.mxu1 %v578_v5  ;;  %p593_p0 = scmp.ne.s32.totalorder %s465_s24, %s592_s0  ;;  %p598_p2 = scmp.lt.s32.totalorder %s592_s0, %s592_s0 }
  0x1a   :  { %527 = vmatprep.subr.bf16.mxu0 %v617_v11  ;;  %417 = vmatprep.subr.bf16.mxu1 %v616_v3 }
  0x1b   :  { %p599_p3 = por %p598_p2, %p597_p1 }
  0x1d   :  { %528 = vmatpush3.bf16.msra.mxu0 %v574_v25  ;;  %418 = vmatpush1.bf16.msra.mxu1 %v579_v6  ;;  %p600_p4 = pnand %p599_p3, %p593_p0 }
  0x1e   :  { %529 = vmatprep.subr.bf16.mxu0 %v617_v11  ;;  %419 = vmatprep.subr.bf16.mxu1 %v616_v3 }
  0x21   :  { %530 = vmatpush3.bf16.msra.mxu0 %v575_v27  ;;  %420 = vmatpush1.bf16.msra.mxu1 %v580_v7 }
  0x22   :  { %531 = vmatprep.subr.bf16.mxu0 %v617_v11  ;;  %421 = vmatprep.subr.bf16.mxu1 %v616_v3 }
  0x25   :  { %532 = vmatpush3.bf16.msra.mxu0 %v190_v30  ;;  %422 = vmatpush1.bf16.msra.mxu1 %v581_v8 }
  0x26   :  { %423 = vmatprep.subr.bf16.mxu1 %v616_v3 }
  0x29   :  { %424 = vmatpush1.bf16.msra.mxu1 %v582_v9 }
  0x2a   :  { %425 = vmatprep.subr.bf16.mxu1 %v616_v3 }
  0x2d   :  { %426 = vmatpush1.bf16.msra.mxu1 %v583_v10 }
  0x2e   :  { %427 = vmatprep.subr.bf16.mxu1 %v616_v3 }
  0x7a   :  { %v57_v26 = vpop.permute.xlu0 %56 }
  0x7b   :  { %63 = vst.msk [vmem:[#allocation2 + $0x1] sm:$0xff] %vm62_vm2, %v57_v26 }
  0x7e   :  { %v59_v28 = vpop.permute.xlu0 %58 }
  0x7f   :  { %64 = vst.msk [vmem:[#allocation2 + $0x9] sm:$0xff] %vm62_vm2, %v59_v28 }
  0x81   :  { %v743_v31 = vpop.permute.xlu1 %85 }
  0x82   :  { %v79_v32 = vld [vmem:[#allocation2 + $0x1] sm:$0xff] }
  0x83   :  { %v65_v33 = vld [vmem:[#allocation2] sm:$0xff] }
  0x85   :  { %v746_v37 = vpop.permute.xlu1 %90 }
  0x86   :  { %v81_v34 = vld [vmem:[#allocation2 + $0x2] sm:$0xff]  ;;  %v82_v35 = vld [vmem:[#allocation2 + $0xa] sm:$0xff] }
  0x87   :  { %v80_v36 = vld [vmem:[#allocation2 + $0x9] sm:$0xff]  ;;  %235 = vst.msk [vmem:[#allocation2] sm:$0xff] %vm49_vm0, %v617_v11  ;;  %v93_v40 = vmul.f32 %v743_v31, %v81_v34  ;;  %v94_v41 = vmul.f32 %v746_v37, %v82_v35 }
  0x88   :  { %v549_v38 = vpack.i.bf16 %v80_v36, %v79_v32  ;;  %237 = vst.msk [vmem:[#allocation2 + $0x10] sm:$0x3] %vm52_vm1, %v617_v11  ;;  %v66_v39 = vld [vmem:[#allocation2 + $0x8] sm:$0xff] }
  0x89   :  { %236 = vst.msk [vmem:[#allocation2 + $0x8] sm:$0xff] %vm49_vm0, %v617_v11  ;;  %v554_v42 = vpack.i.bf16 %v94_v41, %v93_v40  ;;  %v757_v43 = vpop.permute.xlu1 %74  ;;  %v584_v11 = vld [vmem:[%s857_s5 + $0x38] sm:$0xff]  }
  0x8a   :  { %550 = vrot.lane.b32.xlu1 %v549_v38, %s620_s3  ;;  %v78_v48 = vmul.f32 %v757_v43, %v66_v39  ;;  %428 = vmatpush1.bf16.msra.mxu1 %v584_v11 }
  0x8b   :  { %555 = vrot.lane.b32.xlu0 %v554_v42, %s621_s16  ;;  %429 = vmatprep.subr.bf16.mxu1 %v616_v3 }
  0x8e   :  { %430 = vmatpush1.bf16.msra.mxu1 %v585_v12 }
  0x8f   :  { %v759_v44 = vpop.permute.xlu0 %69  ;;  %431 = vmatprep.subr.bf16.mxu1 %v616_v3 }
  0x90   :  { %v77_v49 = vmul.f32 %v759_v44, %v65_v33 }
  0x92   :  { %432 = vmatpush1.bf16.msra.mxu1 %v586_v13 }
  0x93   :  { %433 = vmatprep.subr.bf16.mxu1 %v616_v3 }
  0x96   :  { %434 = vmatpush1.bf16.msra.mxu1 %v587_v14 }
  0x97   :  { %435 = vmatprep.subr.bf16.mxu1 %v616_v3 }
  0x9a   :  { %436 = vmatpush1.bf16.msra.mxu1 %v588_v15 }
  0x9b   :  { %437 = vmatprep.subr.bf16.mxu1 %v616_v3 }
  0x9e   :  { %438 = vmatpush1.bf16.msra.mxu1 %v589_v16 }
  0x9f   :  { %439 = vmatprep.subr.bf16.mxu1 %v616_v3 }
  0xa2   :  { %440 = vmatpush1.bf16.msra.mxu1 %v590_v18 }
  0xa3   :  { %441 = vmatprep.subr.bf16.mxu1 %v616_v3 }
  0xa6   :  { %442 = vmatpush1.bf16.msra.mxu1 %v591_v20 }
  0xfc   :  { %v551_v45 = vpop.permute.xlu1 %550 }
  0xfd   :  { %v553_v46 = vunpack.i.h.bf16 %v551_v45  ;;  %v552_v47 = vunpack.i.l.bf16 %v551_v45  ;;  %v556_v50 = vpop.permute.xlu0 %555 }
  0xfe   :  { %v558_v51 = vunpack.i.h.bf16 %v556_v50  ;;  %v557_v52 = vunpack.i.l.bf16 %v556_v50 }
  0xff   :  { %v112_v53 = vsel %vm111_vm5, %v77_v49, %v552_v47  ;;  %v113_v54 = vsel %vm111_vm5, %v78_v48, %v553_v46  ;;  %v491_v46 = vld [vmem:[%s858_s6] ss:$0 sm:$0xff] }
 0x100   :  { %v115_v55 = vsel %vm49_vm0, %v113_v54, %v558_v51  ;;  %v114_v56 = vsel %vm49_vm0, %v112_v53, %v557_v52 }
 0x101   :  { %v116_v57 = vpack.c.bf16 %v115_v55, %v114_v56 }
 0x103   :  { %534 = vmatmul.mubr.msk.bf16.vlgmr.msra.gmra.mrb[0].mxu0 %vm184_vm6, %v116_v57 }
 0x1d6   :  { %v226_v59 = vpop.f32.mrb[0].mxu0 }
 0x1d7   :  { %v227_v60 = vadd.f32 %v481_v58, %v226_v59  ;;  %v535_v61 = vpop.f32.mrb[1].mxu0 }
 0x1d8   :  { %v229_v62 = vpop.f32.mrb[2].mxu0 }
 0x1d9   :  { %v233_v63 = vmax.f32 %v227_v60, 0.0  ;;  %v230_v0 = vadd.f32 %v481_v58, %v229_v62  ;;  %v536_v1 = vpop.f32.mrb[3].mxu0 }
 0x1db   :  { %v234_v2 = vmax.f32 %v230_v0, 0.0  ;;  %240 = vrot.lane.b32.xlu1 %v233_v63, %s622_s19 }
 0x1dd   :  { %242 = vrot.lane.b32.xlu0 %v234_v2, %s622_s19 }
 0x24d   :  { %v241_v17 = vpop.permute.xlu1 %240 }
 0x24e   :  { %247 = vst.msk [vmem:[#allocation2 + $0x1] sm:$0xff] %vm246_vm7, %v241_v17 }
 0x24f   :  { %v243_v19 = vpop.permute.xlu0 %242 }
 0x250   :  { %248 = vst.msk [vmem:[#allocation2 + $0x9] sm:$0xff] %vm246_vm7, %v243_v19 }
 0x255   :  { %v253_v21 = vld [vmem:[#allocation2 + $0x1] sm:$0xff] }
 0x256   :  { %v249_v29 = vld [vmem:[#allocation2] sm:$0xff] }
 0x257   :  { %v254_v22 = vld [vmem:[#allocation2 + $0x9] sm:$0xff]  ;;  %v251_v35 = vmul.f32 %v249_v29, %v759_v44 }
 0x258   :  { %v255_v23 = vld [vmem:[#allocation2 + $0x2] sm:$0xff]  ;;  %v256_v24 = vld [vmem:[#allocation2 + $0xa] sm:$0xff]  ;;  %v559_v25 = vpack.i.bf16 %v254_v22, %v253_v21 }
 0x259   :  { %v257_v26 = vmul.f32 %v255_v23, %v743_v31  ;;  %v258_v27 = vmul.f32 %v256_v24, %v746_v37  ;;  %v250_v30 = vld [vmem:[#allocation2 + $0x8] sm:$0xff] }
 0x25a   :  { %560 = vrot.lane.b32.xlu1 %v559_v25, %s621_s16  ;;  %v252_v36 = vmul.f32 %v250_v30, %v757_v43 }
 0x25b   :  { %v564_v28 = vpack.i.bf16 %v258_v27, %v257_v26 }
 0x25d   :  { %565 = vrot.lane.b32.xlu0 %v564_v28, %s623_s23 }
 0x2cc   :  { %v561_v32 = vpop.permute.xlu1 %560 }
 0x2cd   :  { %v563_v33 = vunpack.i.h.bf16 %v561_v32  ;;  %v562_v3 = vunpack.i.l.bf16 %v561_v32 }
 0x2cf   :  { %v566_v34 = vpop.permute.xlu0 %565  ;;  %v275_v37 = vsel %vm49_vm0, %v251_v35, %v562_v3  ;;  %v276_v39 = vsel %vm49_vm0, %v252_v36, %v563_v33 }
 0x2d0   :  { %v568_v38 = vunpack.i.h.bf16 %v566_v34  ;;  %v567_v31 = vunpack.i.l.bf16 %v566_v34  ;;  %v280_v45 = vpack.c.bf16 %v276_v39, %v275_v37 }
 0x2d2   :  { %v278_v40 = vsel %vm277_vm8, %v562_v3, %v567_v31  ;;  %v279_v41 = vsel %vm277_vm8, %v563_v33, %v568_v38 }
 0x2d3   :  { %v281_v42 = vpack.c.bf16 %v279_v41, %v278_v40 }
 0x2d5   :  { %507 = vmatprep.mubr.msk.bf16.mxu1 %vm409_vm9, %v281_v42 }
 0x2d6   :  { %446 = vmatmul.mubr.bf16.vlgmr.msra.gmra.mrb[0].mxu1 %v280_v45 }
 0x3a9   :  { %v447_v44 = vpop.f32.mrb[0].mxu1 }
 0x3aa   :  { %v448_v47 = vadd.f32 %v491_v46, %v447_v44  ;;  %v449_v43 = vpop.f32.mrb[1].mxu1 }
 0x3ab   :  { %v450_v48 = vpop.f32.mrb[2].mxu1 }
 0x3ac   :  { %v454_v49 = vmax.f32 %v448_v47, 0.0  ;;  %v451_v50 = vadd.f32 %v491_v46, %v450_v48  ;;  %v452_v51 = vpop.f32.mrb[3].mxu1 }
 0x3ae   :  { %457 = vst.msk [vmem:[#allocation3] sm:$0xff] %vm456_vm10, %v454_v49  ;;  %v455_v52 = vmax.f32 %v451_v50, 0.0 }
 0x3b0   :  { %458 = vst.msk [vmem:[#allocation3 + $0x8] sm:$0xff] %vm456_vm10, %v455_v52 }
 0x3b1   :  { %603 = shalt.err (!%p600_p4)
}
 0x3b2   :  { %s604_s26 = scalar_lea.hbm %s859_s7, 256 }
 0x3b3   :  { %p605_p5 = scmp.ne.s32.totalorder %s859_s7, %s604_s26  ;;  %p608_p6 = scmp.lt.u32.totalorder %s604_s26, %s859_s7 }
 0x3b5   :  { %p610_p7 = pnand %p608_p6, %p605_p5 }
 0x3b7   :  { %613 = shalt.err (!%p610_p7)
}
 0x3b8   :  { %s625_s30 = smov 128  }
 0x3b9   :  { %470 = dma.vmem_to_hbm [thread:$0]  %s465_s24, 256, %s859_s7, [#allocation4], %s625_s30, %s625_s30, %s622_s19  }
 0x3ba   :  { %614 = dma.done.wait [#allocation4], 256  }
 0x3bb   :  { %615 = vsyncadd [#allocation4], 4294967040 }
 0x3bc   :  { %474 = vsyncpa [#allocation4], 1 }

</bundles_post_ra>
